<compile_context>
chip_gen: v7x
topology: tpu7x:2x2x1
jax: 0.10.0
libtpu: 0.0.40
codegen_flags: <defaults>
</compile_context>

<pallas_src>
import functools

import numpy as np
import jax
import jax.numpy as jnp
from jax.experimental import pallas as pl
from jax.experimental.pallas import tpu as pltpu


def _round_up(x, m):
    return ((x + m - 1) // m) * m


# ----------------------------------------------------------------------------
# Pallas kernel: one lane-dense MXU matmul per output tile.
#   out[tile, :] = g_tile @ W_class(tile)        (bias folded into W)
# ----------------------------------------------------------------------------
def _inv_conv_matmul_kernel(tile_class_ref, g_ref, w_ref, o_ref):
    # tile_class_ref (SMEM scalar prefetch) is consumed by the index_maps only.
    del tile_class_ref
    o_ref[...] = jnp.dot(
        g_ref[...], w_ref[0], preferred_element_type=jnp.float32
    ).astype(o_ref.dtype)


# ----------------------------------------------------------------------------
# Tile-size / VMEM budgeting (works on v5e / v6e / v7x)
# ----------------------------------------------------------------------------
def _choose_tile_and_vmem(n_out, kc_pad, c_out_pad):
    budget = 40 << 20  # leave headroom under v7x's 64 MiB/TC
    tn = 128
    for cand in (1024, 512, 256, 128):
        need = (2 * cand * kc_pad * 2        # double-buffered bf16 input tile
                + 2 * kc_pad * c_out_pad * 2  # double-buffered bf16 weight block
                + 2 * cand * c_out_pad * 4)   # double-buffered f32 output tile
        if need <= budget:
            tn = cand
            break
    tn = min(tn, _round_up(max(n_out, 1), 128))
    need = (2 * tn * kc_pad * 2 + 2 * kc_pad * c_out_pad * 2
            + 2 * tn * c_out_pad * 4)
    # explicit scoped-VMEM limit: >= default (32 MiB) so nothing shrinks on
    # v6e/v7x, capped at 48 MiB so it also fits v7x's 64 MiB physical VMEM.
    vmem_limit = int(min(max(need + (4 << 20), 32 << 20), 48 << 20))
    return tn, vmem_limit


# ----------------------------------------------------------------------------
# Host-side plan: parity-compacted rulebook + class grouping + tiling.
# Cached per indice_key (mirrors spconv's indice-pair cache).
# ----------------------------------------------------------------------------
def _build_inverse_conv_plan(in_coords, out_coords, kernel_size, stride,
                             dilation, c_in, c_out):
    K = int(kernel_size)
    d = int(dilation)
    s = tuple(int(v) for v in stride)
    pad = (K // 2) * d              # TODO(synk): assumes forward conv used this padding
    K3 = K ** 3

    in_coords = np.asarray(in_coords, dtype=np.int64)
    out_coords = np.asarray(out_coords, dtype=np.int64)
    n_in, n_out = in_coords.shape[0], out_coords.shape[0]

    # per-axis valid kernel offsets for each output-coordinate residue class
    def _valid(sa):
        return [[k for k in range(K) if (r + pad - k * d) % sa == 0]
                for r in range(sa)]

    vz, vy, vx = _valid(s[0]), _valid(s[1]), _valid(s[2])
    n_classes = s[0] * s[1] * s[2]

    offs_per_class = []
    for rz in range(s[0]):
        for ry in range(s[1]):
            for rx in range(s[2]):
                offs_per_class.append(
                    [kz * K * K + ky * K + kx
                     for kz in vz[rz] for ky in vy[ry] for kx in vx[rx]])
    kc = max(1, max(len(o) for o in offs_per_class))
    class_offsets = np.full((n_classes, kc), -1, dtype=np.int64)
    for c, offs in enumerate(offs_per_class):
        class_offsets[c, :len(offs)] = offs

    # parity class of every output site (anisotropic strides handled per axis)
    s_arr = np.array(s, dtype=np.int64)
    res = out_coords[:, 1:] % s_arr
    class_ids = (res[:, 0] * s[1] + res[:, 1]) * s[2] + res[:, 2]

    # compact rulebook [n_out, kc]: input row feeding slot j (sentinel = n_in)
    if n_in > 0:
        off = class_offsets[class_ids]                       # [n_out, kc]
        off_ok = off >= 0
        off_c = np.where(off_ok, off, 0)
        koff = np.stack([off_c // (K * K), (off_c // K) % K, off_c % K], axis=-1)
        cand = out_coords[:, None, 1:] + pad - koff * d      # [n_out, kc, 3]
        ok = off_ok & np.all(cand >= 0, axis=-1)
        cand_div = cand // s_arr                             # exact for valid offsets

        span = int(max(in_coords[:, 1:].max(initial=0),
                       cand_div.max(initial=0), 0)) + 2

        def _lin(b, z, y, x):
            return ((b * span + z) * span + y) * span + x

        in_keys = _lin(in_coords[:, 0], in_coords[:, 1],
                       in_coords[:, 2], in_coords[:, 3])
        order = np.argsort(in_keys, kind="stable")
        in_sorted = in_keys[order]
        b_out = np.broadcast_to(out_coords[:, None, 0], (n_out, kc))
        keys = np.where(ok, _lin(b_out, cand_div[..., 0],
                                 cand_div[..., 1], cand_div[..., 2]), -1)
        pos = np.minimum(np.searchsorted(in_sorted, keys), n_in - 1)
        hit = ok & (in_sorted[pos] == keys)
        rb_compact = np.where(hit, order[pos], n_in).astype(np.int32)
    else:
        rb_compact = np.full((n_out, kc), n_in, dtype=np.int32)

    # tiling plan
    kc_cols = kc * c_in + 1                    # +1 ones-column for the bias
    kc_pad = _round_up(kc_cols, 128)
    c_out_pad = _round_up(c_out, 128)
    tn, vmem_limit = _choose_tile_and_vmem(n_out, kc_pad, c_out_pad)

    # group outputs by class; pad every class segment to a multiple of tn so
    # no matmul tile mixes two classes (one resident weight block per tile).
    perm = np.argsort(class_ids, kind="stable")
    counts = np.bincount(class_ids, minlength=n_classes)
    n_pad = int(sum(_round_up(int(m), tn) for m in counts if m > 0))
    n_pad = max(n_pad, tn)
    rb_padded = np.full((n_pad, kc), n_in, dtype=np.int32)
    out_rows = np.zeros(max(n_out, 1), dtype=np.int32)
    tile_class = np.zeros(n_pad // tn, dtype=np.int32)
    row_base, tile_base, cursor = 0, 0, 0
    for c in range(n_classes):
        m = int(counts[c])
        if m == 0:
            continue
        idx = perm[cursor:cursor + m]
        cursor += m
        rb_padded[row_base:row_base + m] = rb_compact[idx]
        out_rows[idx] = np.arange(row_base, row_base + m, dtype=np.int32)
        n_tiles_c = _round_up(m, tn) // tn
        tile_class[tile_base:tile_base + n_tiles_c] = c
        row_base += n_tiles_c * tn
        tile_base += n_tiles_c

    # per-class weight gather indices (sentinel offset -> zero weight rows)
    w_gather_idx = np.where(class_offsets >= 0, class_offsets, K3).astype(np.int32)

    return {
        "rb_padded": rb_padded,
        "out_rows": out_rows[:n_out],
        "tile_class": tile_class,
        "w_gather_idx": w_gather_idx,
        "kc": int(kc),
        "kc_pad": int(kc_pad),
        "c_out_pad": int(c_out_pad),
        "tn": int(tn),
        "vmem_limit": int(vmem_limit),
    }


# ----------------------------------------------------------------------------
# Device-side apply: bf16 compact gather -> per-class folded matmul -> unsort.
# ----------------------------------------------------------------------------
@functools.partial(
    jax.jit,
    static_argnames=("kc", "kc_pad", "c_out_pad", "c_out", "tn", "vmem_limit"))
def _apply_inverse_conv(feats, weight, bias, rb_padded, w_gather_idx, tile_class,
                        out_rows, *, kc, kc_pad, c_out_pad, c_out, tn, vmem_limit):
    n_in, c_in = feats.shape
    n_pad = rb_padded.shape[0]
    n_classes = w_gather_idx.shape[0]
    kc_cols = kc * c_in + 1

    # folded bf16 gathered input: cast BEFORE the gather, gather directly to
    # [n_pad, kc, c_in] (no transpose pass), bias ones-column, lane padding.
    feats_ext = jnp.concatenate(
        [feats.astype(jnp.bfloat16), jnp.zeros((1, c_in), jnp.bfloat16)], axis=0)
    g = feats_ext[rb_padded].reshape(n_pad, kc * c_in)
    g = jnp.concatenate(
        [g,
         jnp.ones((n_pad, 1), jnp.bfloat16),
         jnp.zeros((n_pad, kc_pad - kc_cols), jnp.bfloat16)],
        axis=1)

    # per-parity-class compact weight [n_classes, kc_pad, c_out_pad], bias row
    # folded in, padded columns zero so the trimmed output is exact.
    w_ext = jnp.concatenate(
        [weight.astype(jnp.float32), jnp.zeros((1, c_in, c_out), jnp.float32)],
        axis=0)
    w_cls = w_ext[w_gather_idx].reshape(n_classes, kc * c_in, c_out)
    w_cls = jnp.concatenate(
        [w_cls,
         jnp.broadcast_to(bias.astype(jnp.float32).reshape(1, 1, c_out),
                          (n_classes, 1, c_out)),
         jnp.zeros((n_classes, kc_pad - kc_cols, c_out), jnp.float32)],
        axis=1)
    w_cls = jnp.pad(w_cls, ((0, 0), (0, 0), (0, c_out_pad - c_out))
                    ).astype(jnp.bfloat16)

    out_padded = pl.pallas_call(
        _inv_conv_matmul_kernel,
        out_shape=jax.ShapeDtypeStruct((n_pad, c_out_pad), jnp.float32),
        grid_spec=pltpu.PrefetchScalarGridSpec(
            num_scalar_prefetch=1,                 # tile -> class map in SMEM
            grid=(n_pad // tn,),
            in_specs=[
                # gathered compact input, streamed tile by tile
                pl.BlockSpec((tn, kc_pad), lambda i, tc: (i, 0)),
                # per-class folded weight; block index only changes at class
                # boundaries, so it stays VMEM-resident within a class run
                pl.BlockSpec((1, kc_pad, c_out_pad), lambda i, tc: (tc[i], 0, 0)),
            ],
            out_specs=pl.BlockSpec((tn, c_out_pad), lambda i, tc: (i, 0)),
        ),
        compiler_params=pltpu.CompilerParams(
            dimension_semantics=("parallel",),     # dual-TC sharding on v7x
            vmem_limit_bytes=vmem_limit,           # explicit budget (v5e/v6e/v7x)
        ),
    )(tile_class, g, w_cls)

    # un-group back to the caller's output order; channel trim fused into the
    # same gather under jit (no separate full-HBM slice pass).
    return jnp.take(out_padded, out_rows, axis=0)[:, :c_out]


# ----------------------------------------------------------------------------
# Full op: (cached) plan -> compact gather -> Pallas matmul
# ----------------------------------------------------------------------------
def sparse_inverse_conv3d_pallas(feats, in_coords, out_coords, weight, bias, *,
                                 kernel_size, stride, dilation=1, plan=None):
    n_out = int(out_coords.shape[0])
    c_in = int(feats.shape[-1])
    c_out = int(weight.shape[-1])
    if n_out == 0:
        return jnp.zeros((0, c_out), jnp.float32), plan
    if plan is None:
        plan = _build_inverse_conv_plan(np.asarray(in_coords),
                                        np.asarray(out_coords),
                                        kernel_size, stride, dilation,
                                        c_in, c_out)
    out = _apply_inverse_conv(
        feats, weight, bias,
        plan["rb_padded"], plan["w_gather_idx"], plan["tile_class"],
        plan["out_rows"],
        kc=plan["kc"], kc_pad=plan["kc_pad"], c_out_pad=plan["c_out_pad"],
        c_out=c_out, tn=plan["tn"], vmem_limit=plan["vmem_limit"])
    return out, plan


# ----------------------------------------------------------------------------
# Module wrapper mirroring triposf SparseInverseConv3d.forward
# ----------------------------------------------------------------------------
class SparseInverseConv3dPallas:
    def __init__(self, in_channels, out_channels, kernel_size, stride=1,
                 dilation=1, bias=True, indice_key=None, key=None):
        self.in_channels = in_channels
        self.out_channels = out_channels
        self.kernel_size = kernel_size
        self.dilation = dilation
        self.indice_key = indice_key
        self.stride = (tuple(stride) if isinstance(stride, (list, tuple))
                       else (stride,) * 3)

        key = jax.random.PRNGKey(0) if key is None else key
        kw, kb = jax.random.split(key)
        K3 = kernel_size ** 3
        fan_in = in_channels * K3
        bound = 1.0 / np.sqrt(fan_in)
        # spconv weight [kd, kh, kw, C_in, C_out] flattened to [K^3, C_in, C_out]
        self.weight = jax.random.uniform(
            kw, (K3, in_channels, out_channels), jnp.float32, -bound, bound)
        self.bias = (jax.random.uniform(kb, (1, out_channels), jnp.float32,
                                        -bound, bound)
                     if bias else jnp.zeros((1, out_channels), jnp.float32))

    def __call__(self, x):
        spatial_changed = any(s != 1 for s in self.stride)
        if spatial_changed:
            coords = x["spatial_cache"][f"conv_{self.stride}_unsorted_coords"]
            bwd = x["spatial_cache"][f"conv_{self.stride}_sort_bwd"]
            feats = x["feats"][bwd]          # recover the original (unsorted) order
        else:
            coords = x["coords"]
            feats = x["feats"]

        # output active sites come from the cached indice_key (pre-downsample coords)
        out_coords = x["spatial_cache"][f"inv_{self.indice_key}_out_coords"]

        # rulebook / tiling plan cached per indice_key (like spconv indice pairs)
        plan_key = (f"inv_{self.indice_key}_plan_"
                    f"{self.in_channels}x{self.out_channels}")
        plan = x["spatial_cache"].get(plan_key)
        out_feats, plan = sparse_inverse_conv3d_pallas(
            feats, coords, out_coords, self.weight, self.bias,
            kernel_size=self.kernel_size, stride=self.stride,
            dilation=self.dilation, plan=plan)
        x["spatial_cache"][plan_key] = plan

        new_scale = tuple(s // st for s, st in zip(x["scale"], self.stride))
        return {
            "feats": out_feats,
            "coords": out_coords,
            "shape": (x["shape"][0], self.out_channels),
            "layout": None if spatial_changed else x.get("layout"),
            "scale": new_scale,
            "spatial_cache": x["spatial_cache"],
        }


# ----------------------------------------------------------------------------
# Independent reference (dict-based rulebook, full K^3 loop)
# ----------------------------------------------------------------------------
def _reference_inverse_conv(feats_q, in_coords, out_coords, weight_q, bias_q,
                            K, stride, d):
    pad = (K // 2) * d
    table = {tuple(int(v) for v in c): i
             for i, c in enumerate(np.asarray(in_coords))}
    n_out = out_coords.shape[0]
    c_out = weight_q.shape[-1]
    out = np.tile(bias_q.reshape(1, c_out).astype(np.float32), (n_out, 1))
    sz, sy, sx = stride
    for n in range(n_out):
        b, z, y, x = (int(v) for v in out_coords[n])
        kidx = 0
        for kz in range(K):
            for ky in range(K):
                for kx in range(K):
                    cz, cy, cx = z + pad - kz * d, y + pad - ky * d, x + pad - kx * d
                    if (cz >= 0 and cy >= 0 and cx >= 0
                            and cz % sz == 0 and cy % sy == 0 and cx % sx == 0):
                        i = table.get((b, cz // sz, cy // sy, cx // sx))
                        if i is not None:
                            out[n] += feats_q[i] @ weight_q[kidx]
                    kidx += 1
    return out


# ----------------------------------------------------------------------------
if __name__ == "__main__":
    key = jax.random.PRNGKey(0)
    k1, k2, k3, k4 = jax.random.split(key, 4)

    in_ch, out_ch, ksize = 4, 8, 3
    stride = (2, 2, 2)
    grid_fine = 8
    n_fine = 60

    # fine-resolution active voxels (= output sites cached under the indice_key)
    lin = np.array(jax.random.choice(k1, grid_fine ** 3, (n_fine,), replace=False))
    z, rem = np.divmod(lin, grid_fine * grid_fine)
    y, xx = np.divmod(rem, grid_fine)
    fine_coords = np.stack([np.zeros_like(z), z, y, xx], axis=1).astype(np.int32)

    # coarse (downsampled) input voxels
    coarse_coords = np.unique(
        np.concatenate([fine_coords[:, :1], fine_coords[:, 1:] // 2], axis=1),
        axis=0).astype(np.int32)
    n_coarse = coarse_coords.shape[0]

    feats_orig = jax.random.normal(k2, (n_coarse, in_ch), jnp.float32)
    perm = np.array(jax.random.permutation(k3, n_coarse))
    inv_perm = np.argsort(perm).astype(np.int32)   # "sort_bwd"

    x = {
        "feats": feats_orig[perm],                 # sorted features
        "coords": coarse_coords[perm],
        "shape": (n_coarse, in_ch),
        "layout": None,
        "scale": (2, 2, 2),
        "spatial_cache": {
            f"conv_{stride}_unsorted_coords": coarse_coords,
            f"conv_{stride}_sort_bwd": inv_perm,
            "inv_down1_out_coords": fine_coords,
        },
    }

    conv = SparseInverseConv3dPallas(in_ch, out_ch, ksize, stride=stride,
                                     indice_key="down1", key=k4)
    out = conv(x)
    jax.block_until_ready(out["feats"])

    # second call hits the cached rulebook/plan (per-indice_key cache path)
    out2 = conv(x)
    jax.block_until_ready(out2["feats"])

    # ---- reference: quantize operands to bf16 exactly as the kernel does so
    # the tolerance only covers f32 accumulation-order differences ------------
    feats_q = np.asarray(jnp.asarray(feats_orig).astype(jnp.bfloat16)
                         .astype(jnp.float32))
    w_q = np.asarray(conv.weight.astype(jnp.bfloat16).astype(jnp.float32))
    b_q = np.asarray(conv.bias.astype(jnp.bfloat16).astype(jnp.float32))
    ref = _reference_inverse_conv(feats_q, coarse_coords, fine_coords,
                                  w_q, b_q, ksize, stride, 1)

    np.testing.assert_allclose(np.asarray(out["feats"]), ref, rtol=2e-3, atol=2e-3)
    np.testing.assert_allclose(np.asarray(out2["feats"]), np.asarray(out["feats"]),
                               rtol=0, atol=0)
    assert out["feats"].shape == (n_fine, out_ch)
    assert out["feats"].dtype == jnp.float32

    print("KERNEL_OK")
</pallas_src>

<mosaic_0001>
module attributes {stable_mosaic.version = 11 : i64} {
  func.func @_inv_conv_matmul_kernel(%arg0: i32, %arg1: memref<8xi32, #tpu.memory_space<smem>>, %arg2: memref<128x128xbf16, #tpu.memory_space<vmem>>, %arg3: memref<1x128x128xbf16, #tpu.memory_space<vmem>>, %arg4: memref<128x128xf32, #tpu.memory_space<vmem>>) attributes {dimension_semantics = [#tpu.dimension_semantics<parallel>], iteration_bounds = array<i64: 8>, scalar_prefetch = 1 : i64, scratch_operands = 0 : i64, tpu.core_type = #tpu.core_type<tc>, window_params = [{transform_indices = @transform_0, window_bounds = array<i64: 128, 128>}, {transform_indices = @transform_1, window_bounds = array<i64: 1, 128, 128>}, {transform_indices = @transform_2, window_bounds = array<i64: 128, 128>}]} {
    %c0 = arith.constant 0 : index
    %c0_0 = arith.constant 0 : index
    %0 = vector.load %arg2[%c0, %c0_0] : memref<128x128xbf16, #tpu.memory_space<vmem>>, vector<128x128xbf16>
    %c0_1 = arith.constant 0 : index
    %c0_2 = arith.constant 0 : index
    %c0_3 = arith.constant 0 : index
    %1 = vector.load %arg3[%c0_1, %c0_2, %c0_3] : memref<1x128x128xbf16, #tpu.memory_space<vmem>>, vector<1x128x128xbf16>
    %2 = vector.shape_cast %1 : vector<1x128x128xbf16> to vector<128x128xbf16>
    %cst = arith.constant dense<0.000000e+00> : vector<128x128xf32>
    %3 = tpu.matmul %0, %2, %cst {dimension_numbers = #tpu.dot_dimension_numbers<[1], [0], [0], [1], [0, 0, 1, 1], [], []>} : vector<128x128xbf16>, vector<128x128xbf16>, vector<128x128xf32> -> vector<128x128xf32>
    %c0_4 = arith.constant 0 : index
    %c0_5 = arith.constant 0 : index
    %4 = vector.load %arg4[%c0_4, %c0_5] : memref<128x128xf32, #tpu.memory_space<vmem>>, vector<128x128xf32>
    tpu.vector_store %arg4[%c0_4, %c0_5], %3 {strides = array<i32>} : memref<128x128xf32, #tpu.memory_space<vmem>>, vector<128x128xf32>,
    return
  }
  func.func @transform_0(%arg0: i32, %arg1: memref<8xi32, #tpu.memory_space<smem>>) -> (i32, i32) {
    %c0_i32 = arith.constant 0 : i32
    %c0_i32_0 = arith.constant 0 : i32
    return %arg0, %c0_i32 : i32, i32
  }
  func.func @transform_1(%arg0: i32, %arg1: memref<8xi32, #tpu.memory_space<smem>>) -> (i32, i32, i32) {
    %0 = arith.index_cast %arg0 : i32 to index
    %1 = memref.load %arg1[%0] : memref<8xi32, #tpu.memory_space<smem>>
    %c0_i32 = arith.constant 0 : i32
    %c0_i32_0 = arith.constant 0 : i32
    %c0_i32_1 = arith.constant 0 : i32
    return %1, %c0_i32, %c0_i32_0 : i32, i32, i32
  }
  func.func @transform_2(%arg0: i32, %arg1: memref<8xi32, #tpu.memory_space<smem>>) -> (i32, i32) {
    %c0_i32 = arith.constant 0 : i32
    %c0_i32_0 = arith.constant 0 : i32
    return %arg0, %c0_i32 : i32, i32
  }
}

</mosaic_0001>

<bundles_post_ra>
// kernel: _apply_inverse_conv.1
= control target key start
LH: loop header
LB: loop body
LE: loop exit
PB: predicated region body
PF: predicated region fallthrough
CT: control target
= control target key end

     0   :  { %s718_s0 = inlined_call_operand.vmem [shape: s32[8], index: 0, kind: input, shape index: {}]   ;;  %s719_s1 = inlined_call_operand.vmem [shape: bf16[1024,128], index: 1, kind: input, shape index: {}]   ;;  %s720_s2 = inlined_call_operand.vmem [shape: bf16[8,128,128], index: 2, kind: input, shape index: {}]   ;;  %s721_s3 = inlined_call_operand.vmem [shape: f32[1024,128], index: 3, kind: output, shape index: {}]  }
   0x1   :  { %s8_s14 = sshll.u32 %s718_s0, 4  ;;  %s9_s14 = int_to_ptr.vmem [resolvable:$true] %s8_s14 }
   0x2   :  { %s610_s15 = scalar_lea.vmem %s9_s14, 16  ;;  %p615_p1 = scmp.lt.s32.totalorder %s9_s14, %s9_s14 }
   0x3   :  { %p611_p0 = scmp.ne.s32.totalorder %s9_s14, %s610_s15  ;;  %p616_p2 = scmp.lt.s32.totalorder %s610_s15, %s610_s15 }
   0x5   :  { %p617_p3 = por %p616_p2, %p615_p1 }
   0x7   :  { %p618_p4 = pnand %p617_p3, %p611_p0 }
   0x9   :  { %621 = shalt.err (!%p618_p4)  }
   0xa   :  { %s632_s16 = smov [#allocation3]  }
   0xb   :  { %11 = dma.vmem_to_smem %s9_s14, 16, %s632_s16, [#allocation2] }
   0xc   :  { %626 = dma.done.wait [#allocation2], 16 }
   0xd   :  { %627 = vsyncadd [#allocation2], 4294967280 }
   0xe   :  { %13 = sfence }
   0xf   :  { %s656_s17 = smov 0  }
  0x10 LB: > { %s491_s0 = sadd.s32 4294967295, %s630_s17   ;;  %p495_p5 = scmp.ge.s32.totalorder %s630_s17, 1  ;;  %s630_s17 = sphi %s656_s17, %s19_s17  }
  0x11   : > { %p134_p6 = scmp.lt.s32.totalorder %s630_s17, 9 }
  0x13   : > { %p135_p7 = pnand %p495_p5, %p134_p6 }
  0x14   : > { %s168_s18 = sld [smem:[#allocation3 + %s491_s0]] (!%p135_p7)  ;;  %s496_s19 = sshll.u32 (!%p135_p7), %s491_s0, 4 }
  0x15   : > { %138 = sbr.rel (%p135_p7) target bundleno = 290 (0x122), region = 28  ;;  %p163_p8 = scmp.lt.s32.totalorder (!%p135_p7), %s496_s19, 127 }
  0x1a   : > { %p169_p9 = scmp.lt.s32.totalorder (!%p135_p7), %s168_s18, 7 }
  0x1c   : > { %s723_s19 = smov (!%p163_p8, %s496_s19), 127  ;;  %s725_s18 = smov (!%p169_p9, %s168_s18), 7 }
  0x1d   : > { %s497_s20 = sshll.u32 %s723_s19, 2  ;;  %s520_s24 = sshll.u32 %s725_s18, 6 }
  0x1e   : > { %s670_s23 = scalar_lea.vmem %s719_s1, %s497_s20  ;;  %s677_s27 = scalar_lea.vmem %s720_s2, %s520_s24 }
  0x1f   : > { %v602_v0 = vld [vmem:[%s670_s23] sm:$0xff]   ;;  %v595_v3 = vld [vmem:[%s677_s27 + $0x8] sm:$0xff]   ;;  %v596_v4 = vld [vmem:[%s677_s27 + $0x10] sm:$0xff]   ;;  %s501_s28 = sshll.u32 %s723_s19, 3 }
  0x20   : > { %v603_v1 = vld [vmem:[%s670_s23 + $0x20] sm:$0xff]   ;;  %553 = vmatprep.mubr.bf16.mxu0 %v602_v0  ;;  %v597_v5 = vld [vmem:[%s677_s27 + $0x18] sm:$0xff]   ;;  %v599_v7 = vld [vmem:[%s677_s27 + $0x28] sm:$0xff]   ;;  %s697_s4 = scalar_lea.vmem %s721_s3, %s501_s28 }
  0x21   : > { %561 = vmatprep.mubr.bf16.mxu1 %v603_v1  ;;  %v594_v2 = vld [vmem:[%s677_s27] sm:$0xff]   ;;  %v600_v8 = vld [vmem:[%s677_s27 + $0x30] sm:$0xff]   ;;  %v601_v9 = vld [vmem:[%s677_s27 + $0x38] sm:$0xff]  }
  0x22   : > { %537 = vmatprep.subr.bf16.mxu0 %v594_v2  ;;  %569 = vmatprep.subr.bf16.mxu1 %v594_v2  ;;  %v598_v6 = vld [vmem:[%s677_s27 + $0x20] sm:$0xff]   ;;  %v604_v10 = vld [vmem:[%s670_s23 + $0x8] sm:$0xff]   ;;  %v606_v12 = vld [vmem:[%s670_s23 + $0x10] sm:$0xff]  }
  0x23   : > { %538 = vmatpush3.bf16.msra.mxu0 %v594_v2  ;;  %577 = vmatpush3.bf16.msra.mxu1 %v594_v2  ;;  %v605_v11 = vld [vmem:[%s670_s23 + $0x28] sm:$0xff]   ;;  %v607_v13 = vld [vmem:[%s670_s23 + $0x30] sm:$0xff]   ;;  %v608_v14 = vld [vmem:[%s670_s23 + $0x18] sm:$0xff]  }
  0x24   : > { %539 = vmatprep.subr.bf16.mxu0 %v595_v3  ;;  %570 = vmatprep.subr.bf16.mxu1 %v595_v3  ;;  %v609_v15 = vld [vmem:[%s670_s23 + $0x38] sm:$0xff]  }
  0x27   : > { %540 = vmatpush3.bf16.msra.mxu0 %v595_v3  ;;  %578 = vmatpush3.bf16.msra.mxu1 %v595_v3 }
  0x28   : > { %541 = vmatprep.subr.bf16.mxu0 %v596_v4  ;;  %571 = vmatprep.subr.bf16.mxu1 %v596_v4 }
  0x2b   : > { %542 = vmatpush3.bf16.msra.mxu0 %v596_v4  ;;  %579 = vmatpush3.bf16.msra.mxu1 %v596_v4 }
  0x2c   : > { %543 = vmatprep.subr.bf16.mxu0 %v597_v5  ;;  %572 = vmatprep.subr.bf16.mxu1 %v597_v5 }
  0x2f   : > { %544 = vmatpush3.bf16.msra.mxu0 %v597_v5  ;;  %580 = vmatpush3.bf16.msra.mxu1 %v597_v5 }
  0x30   : > { %545 = vmatprep.subr.bf16.mxu0 %v598_v6  ;;  %573 = vmatprep.subr.bf16.mxu1 %v598_v6 }
  0x33   : > { %546 = vmatpush3.bf16.msra.mxu0 %v598_v6  ;;  %581 = vmatpush3.bf16.msra.mxu1 %v598_v6 }
  0x34   : > { %547 = vmatprep.subr.bf16.mxu0 %v599_v7  ;;  %574 = vmatprep.subr.bf16.mxu1 %v599_v7 }
  0x37   : > { %548 = vmatpush3.bf16.msra.mxu0 %v599_v7  ;;  %582 = vmatpush3.bf16.msra.mxu1 %v599_v7 }
  0x38   : > { %549 = vmatprep.subr.bf16.mxu0 %v600_v8  ;;  %575 = vmatprep.subr.bf16.mxu1 %v600_v8 }
  0x3b   : > { %550 = vmatpush3.bf16.msra.mxu0 %v600_v8  ;;  %583 = vmatpush3.bf16.msra.mxu1 %v600_v8 }
  0x3c   : > { %551 = vmatprep.subr.bf16.mxu0 %v601_v9  ;;  %576 = vmatprep.subr.bf16.mxu1 %v601_v9 }
  0x3f   : > { %552 = vmatpush3.bf16.msra.mxu0 %v601_v9  ;;  %584 = vmatpush3.bf16.msra.mxu1 %v601_v9 }
  0x42   : > { %554 = vmatmul.mubr.bf16.vlgmr.msra.gmra.mrb[0].mxu0 %v604_v10  ;;  %562 = vmatmul.mubr.bf16.vlgmr.msra.gmra.mrb[0].mxu1 %v605_v11 }
  0x43   : > { %557 = vmatprep.mubr.bf16.mxu0 %v606_v12  ;;  %565 = vmatprep.mubr.bf16.mxu1 %v607_v13 }
  0x4a   : > { %558 = vmatmul.mubr.bf16.gmra.mrb[4].mxu0 %v608_v14  ;;  %566 = vmatmul.mubr.bf16.gmra.mrb[4].mxu1 %v609_v15 }
 0x115   : > { %v555_v16 = vpop.f32.mrb[0].mxu0  ;;  %v563_v17 = vpop.f32.mrb[0].mxu1 }
 0x116   : > { %409 = vst [vmem:[%s697_s4 + $0x10] sm:$0xff] %v555_v16  ;;  %417 = vst [vmem:[%s697_s4 + $0x50] sm:$0xff] %v563_v17  ;;  %v344_v18 = vpop.f32.mrb[1].mxu0  ;;  %v376_v19 = vpop.f32.mrb[1].mxu1 }
 0x117   : > { %407 = vst [vmem:[%s697_s4] sm:$0xff] %v344_v18  ;;  %415 = vst [vmem:[%s697_s4 + $0x40] sm:$0xff] %v376_v19  ;;  %v556_v20 = vpop.f32.mrb[2].mxu0  ;;  %v564_v21 = vpop.f32.mrb[2].mxu1 }
 0x118   : > { %410 = vst [vmem:[%s697_s4 + $0x18] sm:$0xff] %v556_v20  ;;  %418 = vst [vmem:[%s697_s4 + $0x58] sm:$0xff] %v564_v21  ;;  %v347_v22 = vpop.f32.mrb[3].mxu0  ;;  %v379_v23 = vpop.f32.mrb[3].mxu1 }
 0x119   : > { %408 = vst [vmem:[%s697_s4 + $0x8] sm:$0xff] %v347_v22  ;;  %416 = vst [vmem:[%s697_s4 + $0x48] sm:$0xff] %v379_v23 }
 0x11d   : > { %v559_v24 = vpop.f32.mrb[4].mxu0  ;;  %v567_v25 = vpop.f32.mrb[4].mxu1 }
 0x11e   : > { %413 = vst [vmem:[%s697_s4 + $0x30] sm:$0xff] %v559_v24  ;;  %421 = vst [vmem:[%s697_s4 + $0x70] sm:$0xff] %v567_v25  ;;  %v360_v26 = vpop.f32.mrb[5].mxu0  ;;  %v392_v27 = vpop.f32.mrb[5].mxu1 }
 0x11f   : > { %411 = vst [vmem:[%s697_s4 + $0x20] sm:$0xff] %v360_v26  ;;  %419 = vst [vmem:[%s697_s4 + $0x60] sm:$0xff] %v392_v27  ;;  %v560_v28 = vpop.f32.mrb[6].mxu0  ;;  %v568_v29 = vpop.f32.mrb[6].mxu1 }
 0x120   : > { %414 = vst [vmem:[%s697_s4 + $0x38] sm:$0xff] %v560_v28  ;;  %422 = vst [vmem:[%s697_s4 + $0x78] sm:$0xff] %v568_v29  ;;  %v363_v30 = vpop.f32.mrb[7].mxu0  ;;  %v395_v31 = vpop.f32.mrb[7].mxu1 }
 0x121   : > { %412 = vst [vmem:[%s697_s4 + $0x28] sm:$0xff] %v363_v30  ;;  %420 = vst [vmem:[%s697_s4 + $0x68] sm:$0xff] %v395_v31 }
 0x122 PF: > { %s19_s17 = sadd.s32 1, %s630_s17  }
 0x123   : > { %p16_p10 = scmp.ge.s32.totalorder %s19_s17, 10  }
 0x125   :  { %18 = sbr.rel (!%p16_p10) target bundleno = 16 (0x10), region = 61 }

</bundles_post_ra>
